<compile_context>
chip_gen: v5e
topology: v5e:2x2
jax: 0.10.0
libtpu: 0.0.40
codegen_flags: <defaults>
</compile_context>

<pallas_src>
import functools
import math

import jax
import jax.numpy as jnp
from jax.experimental import pallas as pl
from jax.experimental.pallas import tpu as pltpu


def _build_pe(d_model: int, max_seq_len: int) -> jnp.ndarray:
    """Reproduce the PyTorch module's pe buffer EXACTLY.

    even cols: sin(pos / 10000 ** (2*i/d_model))        (i = even column index)
    odd  cols: cos(pos / (10000 * (2*(i+1)/d_model)))    (division, not power —
               deliberate parity with the original module)
    """
    assert d_model % 2 == 0, "PositionalEncoder requires an even d_model"
    pos = jnp.arange(max_seq_len, dtype=jnp.float32)[:, None]          # (L, 1)
    i_even = jnp.arange(0, d_model, 2, dtype=jnp.float32)[None, :]     # (1, D/2)
    pe_even = jnp.sin(pos / jnp.power(10000.0, 2.0 * i_even / d_model))
    pe_odd = jnp.cos(pos / (10000.0 * (2.0 * (i_even + 1.0) / d_model)))
    pe = jnp.zeros((max_seq_len, d_model), dtype=jnp.float32)
    pe = pe.at[:, 0::2].set(pe_even)
    pe = pe.at[:, 1::2].set(pe_odd)
    return pe


def _pos_enc_kernel(x_ref, pe_ref, o_ref, *, scale):
    # x_ref / pe_ref / o_ref: identical (tp, tn) lane-dense tiles.
    # Single fused VPU mul-add, direct unmasked store — no scratch, no reshapes.
    o_ref[...] = x_ref[...] * scale + pe_ref[...]


def _divisors(n: int):
    ds = set()
    d = 1
    while d * d <= n:
        if n % d == 0:
            ds.add(d)
            ds.add(n // d)
        d += 1
    return sorted(ds)


def _largest_128mult_divisor(n: int, cap: int):
    """Largest multiple of 128 dividing n that is <= cap (None if 128 does not divide n)."""
    if n % 128 != 0:
        return None
    cap = max(cap, 128)
    k = min(cap // 128, n // 128)
    while k >= 1:
        if n % (128 * k) == 0:
            return 128 * k
        k -= 1
    return 128


def _tpu_vmem_capacity_bytes() -> int:
    try:
        return int(pltpu.get_tpu_info().vmem_capacity_bytes)
    except Exception:
        return 64 * 1024 * 1024          # conservative (v7x-sized) fallback


def positional_encoder(x: jnp.ndarray, pe: jnp.ndarray, d_model: int,
                       *, block_bytes: int | None = None) -> jnp.ndarray:
    """x: (B, S, D); pe: (max_seq_len, D). Returns (B, S, D) = x*sqrt(D) + pe[:S]."""
    B, S, D = x.shape
    assert D == d_model
    assert S <= pe.shape[0], "seq_len exceeds the module's max_seq_len"
    scale = float(math.sqrt(d_model))
    itemsize = jnp.dtype(x.dtype).itemsize

    pe_slice = pe[:S, :].astype(x.dtype)        # mirrors self.pe[:, :seq_len]
    L = S * D

    # ---- hardware-derived sizing -------------------------------------------
    vmem_cap = _tpu_vmem_capacity_bytes()
    if block_bytes is None:
        # ~vmem/12 so 2*(x) + 2*(out) + 2*(pe) block buffers stay ~vmem/2.
        block_bytes = min(8 * 1024 * 1024, max(1 << 20, vmem_cap // 12))
    vmem_limit_bytes = max(32 * 1024 * 1024,
                           min((vmem_cap * 3) // 4, 128 * 1024 * 1024))

    # ---- lane tile: largest 128-multiple divisor of L, capped so that
    #      (a) >= 8 sublane rows fit in the byte target and
    #      (b) the whole problem has >= 8 rows when possible (dense sublanes
    #          even for tiny batches).  Fallback: full lane extent.
    cap_tn = max(128, min(block_bytes // (8 * itemsize), (B * L) // 8))
    tn = _largest_128mult_divisor(L, cap_tn)
    if tn is None:
        tn = L                                   # full-extent lanes (masked tail only)
    P = L // tn                                  # pe period, in rows of the 2-D view
    rows = B * P
    max_rows = max(1, block_bytes // (tn * itemsize))

    # ---- row tile (joint sizing with tn toward the byte target) ------------
    # Option A (default): whole pe periods per block (tp = m*P, m | B).
    valid_m = [mm for mm in _divisors(B) if (mm * P) % 8 == 0 or mm * P == rows]
    fit_m = [mm for mm in valid_m if mm * P <= max_rows]
    sub_ts = [t for t in _divisors(P) if t % 8 == 0 and t <= max_rows]
    use_subperiod = (not fit_m) and bool(sub_ts)

    kernel = functools.partial(_pos_enc_kernel, scale=scale)
    x2 = x.reshape(B * P, tn)

    if not use_subperiod:
        if fit_m:
            m = max(fit_m)
        else:
            # Pathological factorization (e.g. huge prime batch with L not a
            # multiple of 128): smallest legal whole-period block.
            m = min(valid_m)
        # Guarantee >=2 grid blocks so both v7x TensorCores get work (when the
        # array is big enough to matter).
        if B // m == 1 and B * L * itemsize >= (1 << 19):
            smaller = [mm for mm in fit_m if mm < m]
            if smaller:
                m = max(smaller)
        tp = m * P
        grid = (B // m,)
        # pe pre-tiled to exactly ONE block: constant block index -> fetched
        # once, VMEM-resident for the whole grid.
        pe_arr = jnp.tile(pe_slice.reshape(L), (m,)).reshape(tp, tn)
        in_specs = [pl.BlockSpec((tp, tn), lambda i: (i, 0)),    # x tile
                    pl.BlockSpec((tp, tn), lambda i: (0, 0))]    # resident pe tile
        out_specs = pl.BlockSpec((tp, tn), lambda i: (i, 0))
        dim_sem = ("parallel",)
    else:
        # Option B: split inside the pe period (tp | P).  pe block index only
        # depends on the OUTER within-period axis -> resident across the inner
        # batch sweep.
        tp = max(sub_ts)
        qn = P // tp
        grid = (qn, B)
        pe_arr = pe_slice.reshape(P, tn)
        in_specs = [pl.BlockSpec((tp, tn), lambda q, b: (b * qn + q, 0)),
                    pl.BlockSpec((tp, tn), lambda q, b: (q, 0))]
        out_specs = pl.BlockSpec((tp, tn), lambda q, b: (b * qn + q, 0))
        dim_sem = ("parallel", "parallel")

    out2 = pl.pallas_call(
        kernel,
        out_shape=jax.ShapeDtypeStruct((B * P, tn), x.dtype),
        grid_spec=pl.GridSpec(
            grid=grid,
            in_specs=in_specs,
            out_specs=out_specs,
        ),
        compiler_params=pltpu.CompilerParams(
            dimension_semantics=dim_sem,
            vmem_limit_bytes=int(vmem_limit_bytes),
        ),
        cost_estimate=pl.CostEstimate(
            flops=2 * B * L,
            transcendentals=0,
            bytes_accessed=(2 * B * L + int(pe_arr.size)) * itemsize,
        ),
    )(x2, pe_arr)

    return out2.reshape(B, S, D)


if __name__ == "__main__":
    d_model = 32
    max_seq_len = 80
    batch, seq = 2, 8

    key = jax.random.PRNGKey(0)
    x = jax.random.normal(key, (batch, seq, d_model), dtype=jnp.float32)
    pe = _build_pe(d_model, max_seq_len)

    out = positional_encoder(x, pe, d_model)
    out = jax.block_until_ready(out)

    ref = x * math.sqrt(d_model) + pe[None, :seq, :]
    assert out.shape == (batch, seq, d_model)
    assert jnp.allclose(out, ref, atol=1e-5, rtol=1e-5)

    # Also exercise the sub-period tiling path (batch=1, forced tiny block
    # budget) so both code paths are validated, still at small shapes.
    xb = jax.random.normal(jax.random.PRNGKey(0), (1, 64, d_model), dtype=jnp.float32)
    outb = jax.block_until_ready(positional_encoder(xb, pe, d_model, block_bytes=4096))
    refb = xb * math.sqrt(d_model) + pe[None, :64, :]
    assert jnp.allclose(outb, refb, atol=1e-5, rtol=1e-5)

    print("KERNEL_OK")
</pallas_src>

<mosaic_0001>
module attributes {stable_mosaic.version = 11 : i64} {
  func.func @_pos_enc_kernel(%arg0: i32, %arg1: memref<4x128xf32, #tpu.memory_space<vmem>>, %arg2: memref<4x128xf32, #tpu.memory_space<vmem>>, %arg3: memref<4x128xf32, #tpu.memory_space<vmem>>) attributes {dimension_semantics = [#tpu.dimension_semantics<parallel>], iteration_bounds = array<i64: 1>, scalar_prefetch = 0 : i64, scratch_operands = 0 : i64, tpu.core_type = #tpu.core_type<tc>, window_params = [{transform_indices = @transform_0, window_bounds = array<i64: 4, 128>}, {pipeline_mode = #tpu.pipeline_mode<synchronous>, transform_indices = @transform_1, window_bounds = array<i64: 4, 128>}, {transform_indices = @transform_2, window_bounds = array<i64: 4, 128>}]} {
    %c0 = arith.constant 0 : index
    %c0_0 = arith.constant 0 : index
    %0 = vector.load %arg1[%c0, %c0_0] : memref<4x128xf32, #tpu.memory_space<vmem>>, vector<4x128xf32>
    %cst = arith.constant 5.65685415 : f32
    %1 = vector.broadcast %cst : f32 to vector<4x128xf32>
    %2 = arith.mulf %0, %1 : vector<4x128xf32>
    %c0_1 = arith.constant 0 : index
    %c0_2 = arith.constant 0 : index
    %3 = vector.load %arg2[%c0_1, %c0_2] : memref<4x128xf32, #tpu.memory_space<vmem>>, vector<4x128xf32>
    %4 = arith.addf %2, %3 : vector<4x128xf32>
    %c0_3 = arith.constant 0 : index
    %c0_4 = arith.constant 0 : index
    %5 = vector.load %arg3[%c0_3, %c0_4] : memref<4x128xf32, #tpu.memory_space<vmem>>, vector<4x128xf32>
    tpu.vector_store %arg3[%c0_3, %c0_4], %4 {strides = array<i32>} : memref<4x128xf32, #tpu.memory_space<vmem>>, vector<4x128xf32>,
    return
  }
  func.func @transform_0(%arg0: i32) -> (i32, i32) {
    %c0_i32 = arith.constant 0 : i32
    %c0_i32_0 = arith.constant 0 : i32
    return %arg0, %c0_i32 : i32, i32
  }
  func.func @transform_1(%arg0: i32) -> (i32, i32) {
    %c0_i32 = arith.constant 0 : i32
    %c0_i32_0 = arith.constant 0 : i32
    %c0_i32_1 = arith.constant 0 : i32
    return %c0_i32, %c0_i32_0 : i32, i32
  }
  func.func @transform_2(%arg0: i32) -> (i32, i32) {
    %c0_i32 = arith.constant 0 : i32
    %c0_i32_0 = arith.constant 0 : i32
    return %arg0, %c0_i32 : i32, i32
  }
}

</mosaic_0001>

<bundles_post_ra>
// kernel: tpu_custom_call.1
= control target key start
LH: loop header
LB: loop body
LE: loop exit
PB: predicated region body
PF: predicated region fallthrough
CT: control target
= control target key end

     0   :  { %7 = vsyncpa [#allocation3], 0  ;;  %s171_s0 = inlined_call_operand.hbm [shape: f32[4,128], index: 0, kind: input, shape index: {}]   ;;  %s172_s1 = inlined_call_operand.hbm [shape: f32[4,128], index: 1, kind: input, shape index: {}]   ;;  %s173_s2 = inlined_call_operand.hbm [shape: f32[4,128], index: 2, kind: output, shape index: {}]  }
   0x1   :  { %8 = vsyncpa [#allocation6], 0 }
   0x2   :  { %9 = vsyncpa [#allocation4], 0  ;;  %s15_s11 = sshll.u32 %s171_s0, 4  ;;  %s144_s12 = smov [#allocation2]   ;;  %s16_s11 = int_to_ptr.hbm [resolvable:$true] %s15_s11 }
   0x3   :  { %s17_s13 = sshll.u32 %s144_s12, 4  ;;  %s26_s16 = sshll.u32 %s172_s1, 4  ;;  %s18_s13 = int_to_ptr.vmem [resolvable:$true] %s17_s13  ;;  %s27_s16 = int_to_ptr.hbm [resolvable:$true] %s26_s16 }
   0x4   :  { %20 = dma.hbm_to_vmem [thread:$0]  %s16_s11, 64, %s18_s13, [#allocation3]  }
   0x5   :  { %s145_s17 = smov [#allocation5]  }
   0x6   :  { %s28_s18 = sshll.u32 %s145_s17, 4  ;;  %s29_s18 = int_to_ptr.vmem [resolvable:$true] %s28_s18 }
   0x7   :  { %31 = dma.hbm_to_vmem [thread:$0]  %s27_s16, 64, %s29_s18, [#allocation6]  }
   0x8   :  { %138 = dma.done.wait [#allocation3], 64  }
   0x9   :  { %139 = vsyncadd [#allocation3], 4294967232 }
   0xa   :  { %140 = dma.done.wait [#allocation6], 64  }
   0xb   :  { %141 = vsyncadd [#allocation6], 4294967232  ;;  %v40_v0 = vld [vmem:[#allocation2] sm:$0xf]  ;;  %v42_v1 = vld [vmem:[#allocation5] sm:$0xf] }
   0xc   :  { %s146_s0 = smov [#allocation7]   ;;  %s52_s22 = sshll.u32 %s173_s2, 4  ;;  %v41_v2 = vmul.f32 5.656854, %v40_v0  ;;  %s53_s22 = int_to_ptr.hbm [resolvable:$true] %s52_s22 }
   0xd   :  { %s50_s19 = sshll.u32 %s146_s0, 4  ;;  %s51_s19 = int_to_ptr.vmem [resolvable:$true] %s50_s19 }
   0xe   :  { %v43_v3 = vadd.f32 %v42_v1, %v41_v2 }
  0x10   :  { %44 = vst [vmem:[#allocation7] sm:$0xf] %v43_v3 }
  0x11   :  { %55 = dma.vmem_to_hbm [thread:$0]  %s51_s19, 64, %s53_s22, [#allocation4]  }
  0x12   :  { %142 = dma.done.wait [#allocation4], 64  }
  0x13   :  { %143 = vsyncadd [#allocation4], 4294967232 }
  0x14   :  { %60 = vsyncpa [#allocation3], 1 }
  0x15   :  { %61 = vsyncpa [#allocation6], 1 }
  0x16   :  { %62 = vsyncpa [#allocation4], 1 }

</bundles_post_ra>
